<compile_context>
chip_gen: v6e
topology: v6e:2x2x1
jax: 0.10.0
libtpu: 0.0.40
codegen_flags: <defaults>
</compile_context>

<pallas_src>
import jax
import jax.numpy as jnp
from jax.experimental import pallas as pl
from jax.experimental.pallas import tpu as pltpu

_SUBLANE = 8
_MAX_TILE_B = 1024  # ~85% of HBM roofline for streamed tiles; well inside VMEM


def _round_up(n, m):
    return ((n + m - 1) // m) * m


def _mlp_softmax_kernel(x_ref, w1_ref, b1_ref, w2_ref, b2_ref, w3_ref, b3_ref,
                        o_ref):
    # All f32: MXU has huge slack here (kernel is HBM-bound), so full precision
    # is free and keeps numerics tight.
    x = x_ref[...]

    h1 = jnp.dot(x, w1_ref[...], preferred_element_type=jnp.float32)
    h1 = jnp.maximum(h1 + b1_ref[...], 0.0)

    h2 = jnp.dot(h1, w2_ref[...], preferred_element_type=jnp.float32)
    h2 = jnp.maximum(h2 + b2_ref[...], 0.0)

    logits = jnp.dot(h2, w3_ref[...], preferred_element_type=jnp.float32)
    logits = logits + b3_ref[...]

    # Numerically stable softmax over the class axis (exact division so each
    # row sums to 1 up to f32 rounding).
    m = jnp.max(logits, axis=-1, keepdims=True)
    e = jnp.exp(logits - m)
    denom = jnp.sum(e, axis=-1, keepdims=True)
    o_ref[...] = (e / denom).astype(o_ref.dtype)


def _choose_tiling(B, max_tile=_MAX_TILE_B):
    """Pick (b_pad, tile_b, grid) with minimal padding and >=2 steps when possible."""
    b8 = _round_up(max(B, 1), _SUBLANE)
    # Enough steps to keep tiles <= max_tile; force >=2 steps when there are at
    # least two sublane groups so both v7x TensorCores get a tile.
    g = max(pl.cdiv(b8, max_tile), 2 if b8 >= 2 * _SUBLANE else 1)
    tile_b = _round_up(pl.cdiv(b8, g), _SUBLANE)
    return g * tile_b, tile_b, g


def acupuncture_forward(x, params):
    """x: (B, input_dim) float32 -> (B, output_dim) float32 probabilities."""
    w1, b1, w2, b2, w3, b3 = params
    B, in_dim = x.shape
    h1_dim = w1.shape[1]
    h2_dim = w2.shape[1]
    out_dim = w3.shape[1]

    b_pad, tile_b, g = _choose_tiling(B)
    if b_pad != B:
        # Tiny pad (< 8*grid + 7 rows); zero rows flow through softmax safely
        # and are sliced off below.
        x = jnp.pad(x, ((0, b_pad - B), (0, 0)))

    def resident(a):  # whole array, same block every grid step -> stays in VMEM
        return pl.BlockSpec(a.shape, lambda i: (0, 0))

    flops = 2 * b_pad * (in_dim * h1_dim + h1_dim * h2_dim + h2_dim * out_dim)
    bytes_accessed = 4 * (b_pad * in_dim + b_pad * out_dim
                          + w1.size + w2.size + w3.size
                          + b1.size + b2.size + b3.size)
    cost = pl.CostEstimate(flops=flops,
                           transcendentals=b_pad * out_dim,
                           bytes_accessed=bytes_accessed)

    out = pl.pallas_call(
        _mlp_softmax_kernel,
        out_shape=jax.ShapeDtypeStruct((b_pad, out_dim), jnp.float32),
        grid=(g,),
        in_specs=[
            pl.BlockSpec((tile_b, in_dim), lambda i: (i, 0)),  # x tiles stream
            resident(w1), resident(b1),
            resident(w2), resident(b2),
            resident(w3), resident(b3),
        ],
        out_specs=pl.BlockSpec((tile_b, out_dim), lambda i: (i, 0)),
        compiler_params=pltpu.CompilerParams(
            dimension_semantics=("parallel",)),  # v7x: both TCs on batch axis
        cost_estimate=cost,
    )(x, w1, b1, w2, b2, w3, b3)

    return out[:B] if b_pad != B else out


def init_params(key, input_dim, output_dim):
    """Deterministic init, mimicking PyTorch's U(-1/sqrt(fan_in), 1/sqrt(fan_in))."""
    dims = [(input_dim, 128), (128, 64), (64, output_dim)]
    params = []
    for fan_in, fan_out in dims:
        kw, kb, key = jax.random.split(key, 3)
        bound = 1.0 / jnp.sqrt(fan_in)
        w = jax.random.uniform(kw, (fan_in, fan_out), jnp.float32, -bound, bound)
        b = jax.random.uniform(kb, (1, fan_out), jnp.float32, -bound, bound)
        params.extend([w, b])
    return tuple(params)


def reference_forward(x, params):
    """Pure-JAX f32 reference matching the PyTorch module."""
    w1, b1, w2, b2, w3, b3 = params
    h1 = jnp.maximum(x @ w1 + b1, 0.0)
    h2 = jnp.maximum(h1 @ w2 + b2, 0.0)
    logits = h2 @ w3 + b3
    return jax.nn.softmax(logits, axis=1)


if __name__ == "__main__":
    key = jax.random.PRNGKey(0)
    input_dim, output_dim = 32, 16
    kx, kx2, kp = jax.random.split(key, 3)
    params = init_params(kp, input_dim, output_dim)

    # Small batch (single grid step, no padding).
    x = jax.random.normal(kx, (8, input_dim), jnp.float32)
    out = jax.block_until_ready(acupuncture_forward(x, params))
    ref = reference_forward(x, params)
    assert out.shape == (8, output_dim)
    assert jnp.allclose(jnp.sum(out, axis=1), 1.0, atol=1e-3)
    assert jnp.allclose(out, ref, atol=2e-3, rtol=2e-3), "mismatch vs JAX reference"

    # Larger, non-multiple batch: exercises batch tiling + small padding (grid=2).
    x2 = jax.random.normal(kx2, (300, input_dim), jnp.float32)
    out2 = jax.block_until_ready(acupuncture_forward(x2, params))
    ref2 = reference_forward(x2, params)
    assert out2.shape == (300, output_dim)
    assert jnp.allclose(jnp.sum(out2, axis=1), 1.0, atol=1e-3)
    assert jnp.allclose(out2, ref2, atol=2e-3, rtol=2e-3), "mismatch vs JAX reference (tiled)"

    print("KERNEL_OK")
</pallas_src>

<mosaic_0001>
module attributes {stable_mosaic.version = 11 : i64} {
  func.func @_mlp_softmax_kernel(%arg0: i32, %arg1: memref<8x32xf32, #tpu.memory_space<vmem>>, %arg2: memref<32x128xf32, #tpu.memory_space<vmem>>, %arg3: memref<1x128xf32, #tpu.memory_space<vmem>>, %arg4: memref<128x64xf32, #tpu.memory_space<vmem>>, %arg5: memref<1x64xf32, #tpu.memory_space<vmem>>, %arg6: memref<64x16xf32, #tpu.memory_space<vmem>>, %arg7: memref<1x16xf32, #tpu.memory_space<vmem>>, %arg8: memref<8x16xf32, #tpu.memory_space<vmem>>) attributes {dimension_semantics = [#tpu.dimension_semantics<parallel>], iteration_bounds = array<i64: 1>, scalar_prefetch = 0 : i64, scratch_operands = 0 : i64, tpu.core_type = #tpu.core_type<tc>, window_params = [{transform_indices = @transform_0, window_bounds = array<i64: 8, 32>}, {pipeline_mode = #tpu.pipeline_mode<synchronous>, transform_indices = @transform_1, window_bounds = array<i64: 32, 128>}, {pipeline_mode = #tpu.pipeline_mode<synchronous>, transform_indices = @transform_2, window_bounds = array<i64: 1, 128>}, {pipeline_mode = #tpu.pipeline_mode<synchronous>, transform_indices = @transform_3, window_bounds = array<i64: 128, 64>}, {pipeline_mode = #tpu.pipeline_mode<synchronous>, transform_indices = @transform_4, window_bounds = array<i64: 1, 64>}, {pipeline_mode = #tpu.pipeline_mode<synchronous>, transform_indices = @transform_5, window_bounds = array<i64: 64, 16>}, {pipeline_mode = #tpu.pipeline_mode<synchronous>, transform_indices = @transform_6, window_bounds = array<i64: 1, 16>}, {transform_indices = @transform_7, window_bounds = array<i64: 8, 16>}]} {
    %c0 = arith.constant 0 : index
    %c0_0 = arith.constant 0 : index
    %0 = vector.load %arg1[%c0, %c0_0] : memref<8x32xf32, #tpu.memory_space<vmem>>, vector<8x32xf32>
    %c0_1 = arith.constant 0 : index
    %c0_2 = arith.constant 0 : index
    %1 = vector.load %arg2[%c0_1, %c0_2] : memref<32x128xf32, #tpu.memory_space<vmem>>, vector<32x128xf32>
    %cst = arith.constant dense<0.000000e+00> : vector<8x128xf32>
    %2 = tpu.matmul %0, %1, %cst {dimension_numbers = #tpu.dot_dimension_numbers<[1], [0], [0], [1], [0, 0, 1, 1], [], []>} : vector<8x32xf32>, vector<32x128xf32>, vector<8x128xf32> -> vector<8x128xf32>
    %c0_3 = arith.constant 0 : index
    %c0_4 = arith.constant 0 : index
    %3 = vector.load %arg3[%c0_3, %c0_4] : memref<1x128xf32, #tpu.memory_space<vmem>>, vector<1x128xf32>
    %4 = vector.broadcast %3 : vector<1x128xf32> to vector<8x128xf32>
    %5 = arith.addf %2, %4 : vector<8x128xf32>
    %cst_5 = arith.constant 0.000000e+00 : f32
    %6 = vector.broadcast %cst_5 : f32 to vector<8x128xf32>
    %7 = arith.maximumf %5, %6 : vector<8x128xf32>
    %c0_6 = arith.constant 0 : index
    %c0_7 = arith.constant 0 : index
    %8 = vector.load %arg4[%c0_6, %c0_7] : memref<128x64xf32, #tpu.memory_space<vmem>>, vector<128x64xf32>
    %cst_8 = arith.constant dense<0.000000e+00> : vector<8x64xf32>
    %9 = tpu.matmul %7, %8, %cst_8 {dimension_numbers = #tpu.dot_dimension_numbers<[1], [0], [0], [1], [0, 0, 1, 1], [], []>} : vector<8x128xf32>, vector<128x64xf32>, vector<8x64xf32> -> vector<8x64xf32>
    %c0_9 = arith.constant 0 : index
    %c0_10 = arith.constant 0 : index
    %10 = vector.load %arg5[%c0_9, %c0_10] : memref<1x64xf32, #tpu.memory_space<vmem>>, vector<1x64xf32>
    %11 = vector.broadcast %10 : vector<1x64xf32> to vector<8x64xf32>
    %12 = arith.addf %9, %11 : vector<8x64xf32>
    %cst_11 = arith.constant 0.000000e+00 : f32
    %13 = vector.broadcast %cst_11 : f32 to vector<8x64xf32>
    %14 = arith.maximumf %12, %13 : vector<8x64xf32>
    %c0_12 = arith.constant 0 : index
    %c0_13 = arith.constant 0 : index
    %15 = vector.load %arg6[%c0_12, %c0_13] : memref<64x16xf32, #tpu.memory_space<vmem>>, vector<64x16xf32>
    %cst_14 = arith.constant dense<0.000000e+00> : vector<8x16xf32>
    %16 = tpu.matmul %14, %15, %cst_14 {dimension_numbers = #tpu.dot_dimension_numbers<[1], [0], [0], [1], [0, 0, 1, 1], [], []>} : vector<8x64xf32>, vector<64x16xf32>, vector<8x16xf32> -> vector<8x16xf32>
    %c0_15 = arith.constant 0 : index
    %c0_16 = arith.constant 0 : index
    %17 = vector.load %arg7[%c0_15, %c0_16] : memref<1x16xf32, #tpu.memory_space<vmem>>, vector<1x16xf32>
    %18 = vector.broadcast %17 : vector<1x16xf32> to vector<8x16xf32>
    %19 = arith.addf %16, %18 : vector<8x16xf32>
    %cst_17 = arith.constant dense<0xFF800000> : vector<8xf32>
    %20 = vector.multi_reduction <maximumf>, %19, %cst_17 [1] : vector<8x16xf32> to vector<8xf32>
    %21 = vector.shape_cast %20 : vector<8xf32> to vector<8x1xf32>
    %22 = vector.broadcast %21 : vector<8x1xf32> to vector<8x16xf32>
    %23 = arith.subf %19, %22 : vector<8x16xf32>
    %24 = math.exp %23 : vector<8x16xf32>
    %cst_18 = arith.constant dense<0.000000e+00> : vector<8xf32>
    %25 = vector.multi_reduction <add>, %24, %cst_18 [1] : vector<8x16xf32> to vector<8xf32>
    %26 = vector.shape_cast %25 : vector<8xf32> to vector<8x1xf32>
    %27 = vector.broadcast %26 : vector<8x1xf32> to vector<8x16xf32>
    %28 = arith.divf %24, %27 : vector<8x16xf32>
    %c0_19 = arith.constant 0 : index
    %c0_20 = arith.constant 0 : index
    %29 = vector.load %arg8[%c0_19, %c0_20] : memref<8x16xf32, #tpu.memory_space<vmem>>, vector<8x16xf32>
    tpu.vector_store %arg8[%c0_19, %c0_20], %28 {strides = array<i32>} : memref<8x16xf32, #tpu.memory_space<vmem>>, vector<8x16xf32>,
    return
  }
  func.func @transform_0(%arg0: i32) -> (i32, i32) {
    %c0_i32 = arith.constant 0 : i32
    %c0_i32_0 = arith.constant 0 : i32
    return %arg0, %c0_i32 : i32, i32
  }
  func.func @transform_1(%arg0: i32) -> (i32, i32) {
    %c0_i32 = arith.constant 0 : i32
    %c0_i32_0 = arith.constant 0 : i32
    %c0_i32_1 = arith.constant 0 : i32
    return %c0_i32, %c0_i32_0 : i32, i32
  }
  func.func @transform_2(%arg0: i32) -> (i32, i32) {
    %c0_i32 = arith.constant 0 : i32
    %c0_i32_0 = arith.constant 0 : i32
    %c0_i32_1 = arith.constant 0 : i32
    return %c0_i32, %c0_i32_0 : i32, i32
  }
  func.func @transform_3(%arg0: i32) -> (i32, i32) {
    %c0_i32 = arith.constant 0 : i32
    %c0_i32_0 = arith.constant 0 : i32
    %c0_i32_1 = arith.constant 0 : i32
    return %c0_i32, %c0_i32_0 : i32, i32
  }
  func.func @transform_4(%arg0: i32) -> (i32, i32) {
    %c0_i32 = arith.constant 0 : i32
    %c0_i32_0 = arith.constant 0 : i32
    %c0_i32_1 = arith.constant 0 : i32
    return %c0_i32, %c0_i32_0 : i32, i32
  }
  func.func @transform_5(%arg0: i32) -> (i32, i32) {
    %c0_i32 = arith.constant 0 : i32
    %c0_i32_0 = arith.constant 0 : i32
    %c0_i32_1 = arith.constant 0 : i32
    return %c0_i32, %c0_i32_0 : i32, i32
  }
  func.func @transform_6(%arg0: i32) -> (i32, i32) {
    %c0_i32 = arith.constant 0 : i32
    %c0_i32_0 = arith.constant 0 : i32
    %c0_i32_1 = arith.constant 0 : i32
    return %c0_i32, %c0_i32_0 : i32, i32
  }
  func.func @transform_7(%arg0: i32) -> (i32, i32) {
    %c0_i32 = arith.constant 0 : i32
    %c0_i32_0 = arith.constant 0 : i32
    return %arg0, %c0_i32 : i32, i32
  }
}

</mosaic_0001>

<bundles_post_ra>
// kernel: tpu_custom_call.1
= control target key start
LH: loop header
LB: loop body
LE: loop exit
PB: predicated region body
PF: predicated region fallthrough
CT: control target
= control target key end

     0   :  { %v454_v1 = vmov 0.0   ;;  %vm455_vm0 = vmmov 0   ;;  %vm39_vm1 = vcmask 261120   ;;  %s633_s0 = inlined_call_operand.vmem [shape: f32[8,32], index: 0, kind: input, shape index: {}]   ;;  %s634_s1 = inlined_call_operand.vmem [shape: f32[32,128], index: 1, kind: input, shape index: {}]   ;;  %s635_s2 = inlined_call_operand.vmem [shape: f32[1,128], index: 2, kind: input, shape index: {}]   ;;  %s636_s3 = inlined_call_operand.vmem [shape: f32[128,64], index: 3, kind: input, shape index: {}]   ;;  %s637_s4 = inlined_call_operand.vmem [shape: f32[1,64], index: 4, kind: input, shape index: {}]   ;;  %s638_s5 = inlined_call_operand.vmem [shape: f32[64,16], index: 5, kind: input, shape index: {}]   ;;  %s639_s6 = inlined_call_operand.vmem [shape: f32[1,16], index: 6, kind: input, shape index: {}]   ;;  %s640_s7 = inlined_call_operand.hbm [shape: f32[8,16], index: 7, kind: output, shape index: {}]  }
   0x1   :  { %v31_v0 = vld [vmem:[%s634_s1 + $0x18] sm:$0xff]  ;;  %360 = vmatprep.subr.mxu0 %v454_v1  ;;  %v30_v2 = vld [vmem:[%s634_s1 + $0x10] sm:$0xff]  ;;  %368 = vmatprep.mubr.msk.f32.mxu0 %vm455_vm0, %v454_v1  ;;  %v29_v5 = vld [vmem:[%s634_s1 + $0x8] sm:$0xff] }
   0x2   :  { %v129_v3 = vld [vmem:[%s636_s3 + $0x78] sm:$0xff]  ;;  %361 = vmatpush3.msra.mxu0 %v31_v0  ;;  %371 = vmatprep.subr.mxu1 %v454_v1  ;;  %v128_v4 = vld [vmem:[%s636_s3 + $0x70] sm:$0xff]  ;;  %v127_v6 = vld [vmem:[%s636_s3 + $0x68] sm:$0xff] }
   0x3   :  { %362 = vmatprep.subr.mxu0 %v454_v1  ;;  %372 = vmatpush3.msra.mxu1 %v129_v3  ;;  %v28_v7 = vld [vmem:[%s634_s1] sm:$0xff] }
   0x4   :  { %363 = vmatpush3.msra.mxu0 %v30_v2  ;;  %373 = vmatprep.subr.mxu1 %v454_v1  ;;  %v27_v8 = vld [vmem:[%s633_s0] sm:$0xff] }
   0x5   :  { %364 = vmatprep.subr.mxu0 %v454_v1  ;;  %374 = vmatpush3.msra.mxu1 %v128_v4  ;;  %v126_v9 = vld [vmem:[%s636_s3 + $0x60] sm:$0xff] }
   0x6   :  { %365 = vmatpush3.msra.mxu0 %v29_v5  ;;  %375 = vmatprep.subr.mxu1 %v454_v1 }
   0x7   :  { %12 = vsyncpa [#allocation3], 0  ;;  %366 = vmatprep.subr.mxu0 %v454_v1  ;;  %376 = vmatpush3.msra.mxu1 %v127_v6  ;;  %v125_v10 = vld [vmem:[%s636_s3 + $0x58] sm:$0xff]  ;;  %v124_v11 = vld [vmem:[%s636_s3 + $0x50] sm:$0xff]  ;;  %vm223_vm2 = vcmask 523264   ;;  %vm297_vm3 = vcmask 130048  }
   0x8   :  { %367 = vmatpush3.msra.mxu0 %v28_v7  ;;  %377 = vmatprep.subr.mxu1 %v454_v1  ;;  %v123_v12 = vld [vmem:[%s636_s3 + $0x48] sm:$0xff]  ;;  %v122_v13 = vld [vmem:[%s636_s3 + $0x40] sm:$0xff]  ;;  %v121_v14 = vld [vmem:[%s636_s3 + $0x38] sm:$0xff] }
   0x9   :  { %369 = vmatmul.mubr.msk.f32.vlgmr.msra.gmra.mxu0 %vm39_vm1, %v27_v8  ;;  %378 = vmatpush3.msra.mxu1 %v126_v9  ;;  %v120_v15 = vld [vmem:[%s636_s3 + $0x30] sm:$0xff]  ;;  %v119_v16 = vld [vmem:[%s636_s3 + $0x28] sm:$0xff]  ;;  %v118_v17 = vld [vmem:[%s636_s3 + $0x20] sm:$0xff] }
   0xa   :  { %379 = vmatprep.subr.mxu1 %v454_v1  ;;  %403 = vmatprep.mubr.msk.f32.mxu1 %vm455_vm0, %v454_v1  ;;  %v117_v18 = vld [vmem:[%s636_s3 + $0x18] sm:$0xff]  ;;  %v116_v19 = vld [vmem:[%s636_s3 + $0x10] sm:$0xff]  ;;  %v115_v20 = vld [vmem:[%s636_s3 + $0x8] sm:$0xff] }
   0xb   :  { %380 = vmatpush3.msra.mxu1 %v125_v10  ;;  %406 = vmatprep.subr.mxu0 %v454_v1  ;;  %v114_v21 = vld [vmem:[%s636_s3] sm:$0xff]  ;;  %v215_v22 = vld [vmem:[%s638_s5 + $0x38] sm:$0xff]  ;;  %v214_v23 = vld [vmem:[%s638_s5 + $0x30] sm:$0xff] }
   0xc   :  { %381 = vmatprep.subr.mxu1 %v454_v1  ;;  %422 = vmatprep.mubr.msk.f32.mxu0 %vm455_vm0, %v454_v1  ;;  %v213_v24 = vld [vmem:[%s638_s5 + $0x28] sm:$0xff]  ;;  %v212_v25 = vld [vmem:[%s638_s5 + $0x20] sm:$0xff]  ;;  %v211_v26 = vld [vmem:[%s638_s5 + $0x18] sm:$0xff] }
   0xd   :  { %382 = vmatpush3.msra.mxu1 %v124_v11  ;;  %407 = vmatpush3.msra.mxu0 %v215_v22  ;;  %v324_v27 = vld [vmem:[%s635_s2] ss:$0 sm:$0xff]  ;;  %v210_v32 = vld [vmem:[%s638_s5 + $0x10] sm:$0xff]  ;;  %v209_v33 = vld [vmem:[%s638_s5 + $0x8] sm:$0xff] }
   0xe   :  { %383 = vmatprep.subr.mxu1 %v454_v1  ;;  %408 = vmatprep.subr.mxu0 %v454_v1  ;;  %v208_v34 = vld [vmem:[%s638_s5] sm:$0xff] }
   0xf   :  { %384 = vmatpush3.msra.mxu1 %v123_v12  ;;  %409 = vmatpush3.msra.mxu0 %v214_v23  ;;  %v326_v35 = vld [vmem:[%s637_s4] ss:$0 sm:$0xff]  ;;  %s456_s4 = smov [#allocation2]  }
  0x10   :  { %385 = vmatprep.subr.mxu1 %v454_v1  ;;  %410 = vmatprep.subr.mxu0 %v454_v1  ;;  %v327_v40 = vld [vmem:[%s639_s6] ss:$0 sm:$0xff]  ;;  %s316_s5 = sshll.u32 %s456_s4, 4  ;;  %s317_s5 = int_to_ptr.vmem [resolvable:$true] %s316_s5 }
  0x11   :  { %386 = vmatpush3.msra.mxu1 %v122_v13  ;;  %411 = vmatpush3.msra.mxu0 %v213_v24  ;;  %s432_s6 = scalar_lea.vmem %s317_s5, 128  ;;  %p437_p1 = scmp.lt.s32.totalorder %s317_s5, %s317_s5 }
  0x12   :  { %387 = vmatprep.subr.mxu1 %v454_v1  ;;  %412 = vmatprep.subr.mxu0 %v454_v1  ;;  %p433_p0 = scmp.ne.s32.totalorder %s317_s5, %s432_s6  ;;  %p438_p2 = scmp.lt.s32.totalorder %s432_s6, %s432_s6 }
  0x13   :  { %388 = vmatpush3.msra.mxu1 %v121_v14  ;;  %413 = vmatpush3.msra.mxu0 %v212_v25 }
  0x14   :  { %389 = vmatprep.subr.mxu1 %v454_v1  ;;  %414 = vmatprep.subr.mxu0 %v454_v1  ;;  %p439_p3 = por %p438_p2, %p437_p1 }
  0x15   :  { %390 = vmatpush3.msra.mxu1 %v120_v15  ;;  %415 = vmatpush3.msra.mxu0 %v211_v26 }
  0x16   :  { %391 = vmatprep.subr.mxu1 %v454_v1  ;;  %416 = vmatprep.subr.mxu0 %v454_v1  ;;  %p440_p4 = pnand %p439_p3, %p433_p0 }
  0x17   :  { %392 = vmatpush3.msra.mxu1 %v119_v16  ;;  %417 = vmatpush3.msra.mxu0 %v210_v32 }
  0x18   :  { %393 = vmatprep.subr.mxu1 %v454_v1  ;;  %418 = vmatprep.subr.mxu0 %v454_v1 }
  0x19   :  { %394 = vmatpush3.msra.mxu1 %v118_v17  ;;  %419 = vmatpush3.msra.mxu0 %v209_v33 }
  0x1a   :  { %395 = vmatprep.subr.mxu1 %v454_v1  ;;  %420 = vmatprep.subr.mxu0 %v454_v1 }
  0x1b   :  { %396 = vmatpush3.msra.mxu1 %v117_v18  ;;  %421 = vmatpush3.msra.mxu0 %v208_v34 }
  0x1c   :  { %397 = vmatprep.subr.mxu1 %v454_v1 }
  0x1d   :  { %398 = vmatpush3.msra.mxu1 %v116_v19 }
  0x1e   :  { %399 = vmatprep.subr.mxu1 %v454_v1 }
  0x1f   :  { %400 = vmatpush3.msra.mxu1 %v115_v20 }
  0x20   :  { %401 = vmatprep.subr.mxu1 %v454_v1 }
  0x21   :  { %402 = vmatpush3.msra.mxu1 %v114_v21 }
  0xc9   :  { %v109_v28 = vpop.f32.mrf.mxu0 }
  0xca   :  { %v110_v29 = vadd.f32 %v324_v27, %v109_v28 }
  0xcb   :  { %v370_v30 = vpop.f32.mrf.mxu0 }
  0xcc   :  { %v113_v31 = vmax.f32 %v110_v29, 0.0 }
  0xce   :  { %404 = vmatmul.mubr.f32.vlgmr.msra.gmra.mxu1 %v113_v31 }
 0x18e   :  { %v203_v36 = vpop.f32.mrf.mxu1 }
 0x18f   :  { %v204_v37 = vadd.f32 %v326_v35, %v203_v36 }
 0x190   :  { %v405_v38 = vpop.f32.mrf.mxu1 }
 0x191   :  { %v207_v39 = vmax.f32 %v204_v37, 0.0 }
 0x193   :  { %423 = vmatmul.mubr.msk.f32.vlgmr.msra.gmra.mxu0 %vm223_vm2, %v207_v39 }
 0x253   :  { %v293_v41 = vpop.f32.mrf.mxu0 }
 0x254   :  { %v294_v42 = vadd.f32 %v327_v40, %v293_v41 }
 0x255   :  { %v424_v43 = vpop.f32.mrf.mxu0 }
 0x256   :  { %v298_v44 = vsel %vm297_vm3, %v294_v42, -inf }
 0x257   :  { %299 = vmax.xlane.f32.xlu0 %v298_v44 }
 0x2e0   :  { %v300_v45 = vpop.xlane.xlu0 %299 }
 0x2e1   :  { %v301_v46 = vsub.f32 %v294_v42, %v300_v45 }
 0x2e3   :  { %v302_v47 = vmul.f32 1.442695, %v301_v46 }
 0x2e5   :  { %428 = vpow2.f32 %v302_v47 }
 0x2f2   :  { %v429_v48 = vpop.eup %428 }
 0x2f3   :  { %v304_v49 = vsel %vm297_vm3, %v429_v48, 0.0 }
 0x2f4   :  { %305 = vadd.xlane.f32.xlu0 %v304_v49 }
 0x37d   :  { %v306_v50 = vpop.xlane.xlu0 %305 }
 0x37e   :  { %430 = vrcp.f32 %v306_v50 }
 0x38b   :  { %v431_v51 = vpop.eup %430 }
 0x38c   :  { %v308_v52 = vmul.f32 %v431_v51, %v429_v48 }
 0x38e   :  { %309 = vst.msk [vmem:[#allocation2] sm:$0xff] %vm297_vm3, %v308_v52 }
 0x38f   :  { %443 = shalt.err (!%p440_p4)
}
 0x390   :  { %319 = dma.vmem_to_hbm [thread:$0]  %s317_s5, 128, %s640_s7, [#allocation3]  }
 0x391   :  { %452 = dma.done.wait [#allocation3], 128  }
 0x392   :  { %453 = vsyncadd [#allocation3], 4294967168 }
 0x393   :  { %323 = vsyncpa [#allocation3], 1 }

</bundles_post_ra>
